<compile_context>
chip_gen: v7x
topology: tpu7x:2x2x1
jax: 0.10.0
libtpu: 0.0.40
codegen_flags: <defaults>
</compile_context>

<pallas_src>
import functools

import jax
import jax.numpy as jnp
from jax.experimental import pallas as pl
from jax.experimental.pallas import tpu as pltpu


def _round_up(x, m):
    return ((x + m - 1) // m) * m


# ----------------------------------------------------------------------------
# Kernels
# ----------------------------------------------------------------------------
def merged_model_kernel_single(q_ref, img_ref,
                               wq_ref, bq_ref,
                               wi_ref, bi_ref,
                               w1_ref, b1_ref,
                               out_ref):
    """Grid = (batch_tiles,). The whole (padded) class axis fits in one tile, so
    both projections, the elementwise fusion, fc1 and log_softmax run fused per
    batch tile with no intermediate HBM round trips."""
    q_out = jnp.dot(q_ref[...], wq_ref[...],
                    preferred_element_type=jnp.float32) + bq_ref[...]
    img_out = jnp.dot(img_ref[...], wi_ref[...],
                      preferred_element_type=jnp.float32) + bi_ref[...]
    # x = img_out * q_out ; squeeze(1) already reflected by 2-D shapes.
    x = (img_out * q_out).astype(jnp.bfloat16)

    logits = jnp.dot(x, w1_ref[...],
                     preferred_element_type=jnp.float32) + b1_ref[...]
    # Padded class columns carry a -1e30 bias -> already masked; exp() -> 0.
    m = jnp.max(logits, axis=-1, keepdims=True)
    shifted = logits - m
    lse = jnp.log(jnp.sum(jnp.exp(shifted), axis=-1, keepdims=True))
    out_ref[...] = (shifted - lse).astype(out_ref.dtype)


def merged_model_kernel_tiled(q_ref, img_ref,
                              wq_ref, bq_ref,
                              wi_ref, bi_ref,
                              w1_ref, b1_ref,
                              out_ref,
                              x_ref,
                              *, tile_n):
    """Grid = (batch_tiles, class_tiles). The fused activation x is computed
    once per batch tile (j == 0), fc1 runs per streamed w1 class tile, and the
    log_softmax is finalized on the last class tile while the full-width output
    block is still resident in VMEM.

    NOTE: correctness relies on the output BlockSpec using a constant index map
    over j (resident accumulator) with default single-buffering, and the class
    axis being 'arbitrary' -- do not multi-buffer the output or mark j parallel.
    """
    j = pl.program_id(1)

    @pl.when(j == 0)
    def _():
        q_out = jnp.dot(q_ref[...], wq_ref[...],
                        preferred_element_type=jnp.float32) + bq_ref[...]
        img_out = jnp.dot(img_ref[...], wi_ref[...],
                          preferred_element_type=jnp.float32) + bi_ref[...]
        x_ref[...] = (img_out * q_out).astype(x_ref.dtype)

    # fc1 for this tile of class columns; single 128-aligned dynamic lane store.
    logits = jnp.dot(x_ref[...], w1_ref[...],
                     preferred_element_type=jnp.float32) + b1_ref[...]
    col0 = pl.multiple_of(j * tile_n, 128)
    out_ref[:, pl.ds(col0, tile_n)] = logits.astype(out_ref.dtype)

    # log_softmax over the full (padded) class axis on the last class tile.
    # Padded columns carry a -1e30 bias, so no explicit mask is needed.
    @pl.when(j == pl.num_programs(1) - 1)
    def _():
        full = out_ref[...]
        m = jnp.max(full, axis=-1, keepdims=True)
        shifted = full - m
        lse = jnp.log(jnp.sum(jnp.exp(shifted), axis=-1, keepdims=True))
        out_ref[...] = (shifted - lse).astype(out_ref.dtype)


# ----------------------------------------------------------------------------
# Parameter preparation (done ONCE at init, not per forward call)
# ----------------------------------------------------------------------------
def prepare_params(params, *, tile_n=None, single_tile_budget_bytes=32 * 1024 * 1024):
    """Cast weights to bf16 and pad the class axis once (hoisted out of the
    per-call forward path). Biases stay f32; padded bias columns get -1e30 so
    the kernel never needs to mask padded logits."""
    wq = params["wq"].astype(jnp.bfloat16)
    wi = params["wi"].astype(jnp.bfloat16)
    w1 = params["w1"].astype(jnp.bfloat16)
    bq = params["bq"].astype(jnp.float32).reshape(1, -1)
    bi = params["bi"].astype(jnp.float32).reshape(1, -1)
    b1 = params["b1"].astype(jnp.float32).reshape(1, -1)

    concat = wq.shape[1]
    num_classes = w1.shape[1]

    if tile_n is None:
        # Prefer a single full-width class tile when the double-buffered w1
        # block fits in budget (at module defaults concat=2048, classes~2048
        # this is 16 MiB -> single tile on every generation).
        n_pad = _round_up(num_classes, 128)
        if 2 * concat * n_pad * 2 <= single_tile_budget_bytes:
            tile_n = n_pad
        else:
            tile_n = 512  # multiple of 256 -> full MXU output width on v6e/v7x
            n_pad = _round_up(num_classes, tile_n)
    else:
        tile_n = _round_up(tile_n, 128)
        n_pad = _round_up(num_classes, tile_n)

    if n_pad != num_classes:
        w1 = jnp.pad(w1, ((0, 0), (0, n_pad - num_classes)))
        b1 = jnp.pad(b1, ((0, 0), (0, n_pad - num_classes)),
                     constant_values=-1e30)

    return {
        "wq": wq, "bq": bq, "wi": wi, "bi": bi, "w1": w1, "b1": b1,
        "concat": concat, "num_classes": num_classes,
        "n_pad": n_pad, "tile_n": tile_n,
    }


def _vmem_estimate(tile_b, q_dim, img_dim, concat, tile_n, n_pad,
                   num_n_tiles, w1_bufs):
    est = 0
    est += 2 * tile_b * q_dim * 2          # question blocks (bf16, 2 bufs)
    est += 2 * tile_b * img_dim * 2        # image blocks (bf16, 2 bufs)
    est += 2 * q_dim * concat * 2          # wq (bf16, 2 bufs)
    est += 2 * img_dim * concat * 2        # wi (bf16, 2 bufs)
    est += 2 * 2 * concat * 4              # bq + bi (f32, 2 bufs each)
    est += w1_bufs * concat * tile_n * 2   # w1 tiles (bf16)
    est += 2 * tile_n * 4                  # b1 tile (f32, 2 bufs)
    est += 2 * tile_b * n_pad * 4          # output block (f32, 2 bufs)
    if num_n_tiles > 1:
        est += tile_b * concat * 2         # fused-x scratch (bf16)
    # headroom for compiler-internal scratch; cap keeps v7x (64 MiB VMEM) safe.
    limit = int(est * 1.5) + (4 << 20)
    return min(max(limit, 16 << 20), 48 << 20)


# ----------------------------------------------------------------------------
# Forward
# ----------------------------------------------------------------------------
def merged_model_forward(question, image, prepared, *, tile_b=128):
    """question: (B, Q_DIM) f32 ; image: (B, C, H, W) f32 (NCHW).
    `prepared` comes from prepare_params() (weights pre-cast / pre-padded)."""
    B = question.shape[0]
    img_flat = image.reshape(B, -1)  # NCHW -> (B, C*H*W)

    wq, bq = prepared["wq"], prepared["bq"]
    wi, bi = prepared["wi"], prepared["bi"]
    w1, b1 = prepared["w1"], prepared["b1"]
    concat = prepared["concat"]
    num_classes = prepared["num_classes"]
    n_pad = prepared["n_pad"]
    tile_n = prepared["tile_n"]

    q_dim = wq.shape[0]
    img_dim = wi.shape[0]
    assert img_flat.shape[1] == img_dim

    # bf16 activations for the MXU (weights were pre-cast at init).
    q_in = question.astype(jnp.bfloat16)
    img_in = img_flat.astype(jnp.bfloat16)

    # Pad / tile the batch axis to a multiple of 16 (bf16 sublane packing).
    if B <= tile_b:
        b_pad = _round_up(B, 16)
        tile_b = b_pad
    else:
        tile_b = _round_up(tile_b, 16)
        b_pad = _round_up(B, tile_b)
    if b_pad != B:
        q_in = jnp.pad(q_in, ((0, b_pad - B), (0, 0)))
        img_in = jnp.pad(img_in, ((0, b_pad - B), (0, 0)))

    num_b_tiles = b_pad // tile_b
    num_n_tiles = n_pad // tile_n
    # TODO(synk): on v7x, if the workload is compute-bound and B <= 128, drop
    # tile_b to 64 so num_b_tiles >= 2 and both TensorCores get batch tiles.

    flops = int(2 * b_pad * (q_dim + img_dim) * concat
                + 2 * b_pad * concat * n_pad)
    bytes_accessed = int(
        q_in.size * 2 + img_in.size * 2
        + wq.size * 2 + wi.size * 2 + w1.size * 2
        + (bq.size + bi.size + b1.size) * 4
        + b_pad * n_pad * 4)
    cost = pl.CostEstimate(flops=flops,
                           transcendentals=int(b_pad * n_pad),
                           bytes_accessed=bytes_accessed)

    w1_bufs = 3 if num_n_tiles >= 3 else 2
    vmem_limit = _vmem_estimate(tile_b, q_dim, img_dim, concat, tile_n, n_pad,
                                num_n_tiles, w1_bufs)

    if num_n_tiles == 1:
        # Fast path: single wide class tile, grid over batch tiles only.
        out = pl.pallas_call(
            merged_model_kernel_single,
            out_shape=jax.ShapeDtypeStruct((b_pad, n_pad), jnp.float32),
            grid=(num_b_tiles,),
            in_specs=[
                pl.BlockSpec((tile_b, q_dim), lambda i: (i, 0)),     # question
                pl.BlockSpec((tile_b, img_dim), lambda i: (i, 0)),   # image
                pl.BlockSpec((q_dim, concat), lambda i: (0, 0)),     # wq
                pl.BlockSpec((1, concat), lambda i: (0, 0)),         # bq
                pl.BlockSpec((img_dim, concat), lambda i: (0, 0)),   # wi
                pl.BlockSpec((1, concat), lambda i: (0, 0)),         # bi
                pl.BlockSpec((concat, n_pad), lambda i: (0, 0)),     # w1
                pl.BlockSpec((1, n_pad), lambda i: (0, 0)),          # b1
            ],
            out_specs=pl.BlockSpec((tile_b, n_pad), lambda i: (i, 0)),
            compiler_params=pltpu.CompilerParams(
                dimension_semantics=("parallel",),
                vmem_limit_bytes=vmem_limit,
            ),
            cost_estimate=cost,
        )(q_in, img_in, wq, bq, wi, bi, w1, b1)
    else:
        # Streamed-w1 path for very wide class counts.
        if w1_bufs == 3:
            w1_spec = pl.BlockSpec((concat, tile_n), lambda i, j: (0, j),
                                   pipeline_mode=pl.Buffered(3))
        else:
            w1_spec = pl.BlockSpec((concat, tile_n), lambda i, j: (0, j))
        kernel = functools.partial(merged_model_kernel_tiled, tile_n=tile_n)
        out = pl.pallas_call(
            kernel,
            out_shape=jax.ShapeDtypeStruct((b_pad, n_pad), jnp.float32),
            grid=(num_b_tiles, num_n_tiles),
            in_specs=[
                pl.BlockSpec((tile_b, q_dim), lambda i, j: (i, 0)),    # question
                pl.BlockSpec((tile_b, img_dim), lambda i, j: (i, 0)),  # image
                pl.BlockSpec((q_dim, concat), lambda i, j: (0, 0)),    # wq
                pl.BlockSpec((1, concat), lambda i, j: (0, 0)),        # bq
                pl.BlockSpec((img_dim, concat), lambda i, j: (0, 0)),  # wi
                pl.BlockSpec((1, concat), lambda i, j: (0, 0)),        # bi
                w1_spec,                                               # w1 (streamed)
                pl.BlockSpec((1, tile_n), lambda i, j: (0, j)),        # b1 (streamed)
            ],
            # Resident output accumulator across the class axis (constant j map).
            out_specs=pl.BlockSpec((tile_b, n_pad), lambda i, j: (i, 0)),
            scratch_shapes=[pltpu.VMEM((tile_b, concat), jnp.bfloat16)],  # fused x
            compiler_params=pltpu.CompilerParams(
                dimension_semantics=("parallel", "arbitrary"),
                vmem_limit_bytes=vmem_limit,
            ),
            cost_estimate=cost,
        )(q_in, img_in, wq, bq, wi, bi, w1, b1)

    return out[:B, :num_classes]


# ----------------------------------------------------------------------------
# Reference / demo
# ----------------------------------------------------------------------------
def make_params(key, q_dim, img_dim, concat_size, num_classes):
    ks = jax.random.split(key, 6)
    scale = 0.02
    return {
        "wq": scale * jax.random.normal(ks[0], (q_dim, concat_size), jnp.float32),
        "bq": scale * jax.random.normal(ks[1], (1, concat_size), jnp.float32),
        "wi": scale * jax.random.normal(ks[2], (img_dim, concat_size), jnp.float32),
        "bi": scale * jax.random.normal(ks[3], (1, concat_size), jnp.float32),
        "w1": scale * jax.random.normal(ks[4], (concat_size, num_classes), jnp.float32),
        "b1": scale * jax.random.normal(ks[5], (1, num_classes), jnp.float32),
    }


def reference_forward(question, image, params):
    """Pure-JAX reference mirroring the PyTorch forward semantics, with the
    same bf16 rounding of weights/activations the kernel applies."""
    f32 = jnp.float32
    B = question.shape[0]
    img_flat = image.reshape(B, -1)
    q = question.astype(jnp.bfloat16).astype(f32)
    im = img_flat.astype(jnp.bfloat16).astype(f32)
    wq = params["wq"].astype(jnp.bfloat16).astype(f32)
    wi = params["wi"].astype(jnp.bfloat16).astype(f32)
    w1 = params["w1"].astype(jnp.bfloat16).astype(f32)
    q_out = q @ wq + params["bq"]
    img_out = im @ wi + params["bi"]
    x = (img_out * q_out).astype(jnp.bfloat16).astype(f32)
    logits = x @ w1 + params["b1"]
    return jax.nn.log_softmax(logits, axis=1)


if __name__ == "__main__":
    # Small shapes consistent with the module (concat_size, num_classes shrunk).
    # NUM_CLASSES=500 exercises class-axis padding (-> 512) on both paths and
    # gives 4 class tiles at tile_n=128 for the streamed/triple-buffered path.
    B = 8
    Q_DIM = 32
    C, H, W = 3, 16, 16
    CONCAT_SIZE = 256   # module default 2048, shrunk for the demo
    NUM_CLASSES = 500   # module default 2000, shrunk for the demo

    key = jax.random.PRNGKey(0)
    k_q, k_img, k_p = jax.random.split(key, 3)

    question = jax.random.normal(k_q, (B, Q_DIM), jnp.float32)
    image = jax.random.normal(k_img, (B, C, H, W), jnp.float32)   # NCHW
    params = make_params(k_p, Q_DIM, C * H * W, CONCAT_SIZE, NUM_CLASSES)

    ref = reference_forward(question, image, params)

    # 1) Default fast path: single wide class tile, grid over batch tiles only.
    prepared = prepare_params(params)
    out = merged_model_forward(question, image, prepared)
    out = jax.block_until_ready(out)
    assert out.shape == (B, NUM_CLASSES)
    assert jnp.allclose(out, ref, atol=2e-3, rtol=2e-3), \
        f"single-tile max abs err = {jnp.max(jnp.abs(out - ref))}"

    # 2) Streamed-w1 path (forced narrow tile): resident output accumulator,
    #    dynamic 128-aligned stores, Buffered(3) weight pipeline.
    prepared_tiled = prepare_params(params, tile_n=128)
    out_t = merged_model_forward(question, image, prepared_tiled)
    out_t = jax.block_until_ready(out_t)
    assert out_t.shape == (B, NUM_CLASSES)
    assert jnp.allclose(out_t, ref, atol=2e-3, rtol=2e-3), \
        f"tiled max abs err = {jnp.max(jnp.abs(out_t - ref))}"

    print("KERNEL_OK")
</pallas_src>

<mosaic_0001>
module attributes {stable_mosaic.version = 11 : i64} {
  func.func @merged_model_kernel_single(%arg0: i32, %arg1: memref<16x32xbf16, #tpu.memory_space<vmem>>, %arg2: memref<16x768xbf16, #tpu.memory_space<vmem>>, %arg3: memref<32x256xbf16, #tpu.memory_space<vmem>>, %arg4: memref<1x256xf32, #tpu.memory_space<vmem>>, %arg5: memref<768x256xbf16, #tpu.memory_space<vmem>>, %arg6: memref<1x256xf32, #tpu.memory_space<vmem>>, %arg7: memref<256x512xbf16, #tpu.memory_space<vmem>>, %arg8: memref<1x512xf32, #tpu.memory_space<vmem>>, %arg9: memref<16x512xf32, #tpu.memory_space<vmem>>) attributes {dimension_semantics = [#tpu.dimension_semantics<parallel>], iteration_bounds = array<i64: 1>, scalar_prefetch = 0 : i64, scratch_operands = 0 : i64, tpu.core_type = #tpu.core_type<tc>, window_params = [{transform_indices = @transform_0, window_bounds = array<i64: 16, 32>}, {transform_indices = @transform_1, window_bounds = array<i64: 16, 768>}, {pipeline_mode = #tpu.pipeline_mode<synchronous>, transform_indices = @transform_2, window_bounds = array<i64: 32, 256>}, {pipeline_mode = #tpu.pipeline_mode<synchronous>, transform_indices = @transform_3, window_bounds = array<i64: 1, 256>}, {pipeline_mode = #tpu.pipeline_mode<synchronous>, transform_indices = @transform_4, window_bounds = array<i64: 768, 256>}, {pipeline_mode = #tpu.pipeline_mode<synchronous>, transform_indices = @transform_5, window_bounds = array<i64: 1, 256>}, {pipeline_mode = #tpu.pipeline_mode<synchronous>, transform_indices = @transform_6, window_bounds = array<i64: 256, 512>}, {pipeline_mode = #tpu.pipeline_mode<synchronous>, transform_indices = @transform_7, window_bounds = array<i64: 1, 512>}, {transform_indices = @transform_8, window_bounds = array<i64: 16, 512>}]} {
    %c0 = arith.constant 0 : index
    %c0_0 = arith.constant 0 : index
    %0 = vector.load %arg1[%c0, %c0_0] : memref<16x32xbf16, #tpu.memory_space<vmem>>, vector<16x32xbf16>
    %c0_1 = arith.constant 0 : index
    %c0_2 = arith.constant 0 : index
    %1 = vector.load %arg3[%c0_1, %c0_2] : memref<32x256xbf16, #tpu.memory_space<vmem>>, vector<32x256xbf16>
    %cst = arith.constant dense<0.000000e+00> : vector<16x256xf32>
    %2 = tpu.matmul %0, %1, %cst {dimension_numbers = #tpu.dot_dimension_numbers<[1], [0], [0], [1], [0, 0, 1, 1], [], []>} : vector<16x32xbf16>, vector<32x256xbf16>, vector<16x256xf32> -> vector<16x256xf32>
    %c0_3 = arith.constant 0 : index
    %c0_4 = arith.constant 0 : index
    %3 = vector.load %arg4[%c0_3, %c0_4] : memref<1x256xf32, #tpu.memory_space<vmem>>, vector<1x256xf32>
    %4 = vector.broadcast %3 : vector<1x256xf32> to vector<16x256xf32>
    %5 = arith.addf %2, %4 : vector<16x256xf32>
    %c0_5 = arith.constant 0 : index
    %c0_6 = arith.constant 0 : index
    %6 = vector.load %arg2[%c0_5, %c0_6] : memref<16x768xbf16, #tpu.memory_space<vmem>>, vector<16x768xbf16>
    %c0_7 = arith.constant 0 : index
    %c0_8 = arith.constant 0 : index
    %7 = vector.load %arg5[%c0_7, %c0_8] : memref<768x256xbf16, #tpu.memory_space<vmem>>, vector<768x256xbf16>
    %cst_9 = arith.constant dense<0.000000e+00> : vector<16x256xf32>
    %8 = tpu.matmul %6, %7, %cst_9 {dimension_numbers = #tpu.dot_dimension_numbers<[1], [0], [0], [1], [0, 0, 1, 1], [], []>} : vector<16x768xbf16>, vector<768x256xbf16>, vector<16x256xf32> -> vector<16x256xf32>
    %c0_10 = arith.constant 0 : index
    %c0_11 = arith.constant 0 : index
    %9 = vector.load %arg6[%c0_10, %c0_11] : memref<1x256xf32, #tpu.memory_space<vmem>>, vector<1x256xf32>
    %10 = vector.broadcast %9 : vector<1x256xf32> to vector<16x256xf32>
    %11 = arith.addf %8, %10 : vector<16x256xf32>
    %12 = arith.mulf %11, %5 : vector<16x256xf32>
    %13 = arith.truncf %12 : vector<16x256xf32> to vector<16x256xbf16>
    %c0_12 = arith.constant 0 : index
    %c0_13 = arith.constant 0 : index
    %14 = vector.load %arg7[%c0_12, %c0_13] : memref<256x512xbf16, #tpu.memory_space<vmem>>, vector<256x512xbf16>
    %cst_14 = arith.constant dense<0.000000e+00> : vector<16x512xf32>
    %15 = tpu.matmul %13, %14, %cst_14 {dimension_numbers = #tpu.dot_dimension_numbers<[1], [0], [0], [1], [0, 0, 1, 1], [], []>} : vector<16x256xbf16>, vector<256x512xbf16>, vector<16x512xf32> -> vector<16x512xf32>
    %c0_15 = arith.constant 0 : index
    %c0_16 = arith.constant 0 : index
    %16 = vector.load %arg8[%c0_15, %c0_16] : memref<1x512xf32, #tpu.memory_space<vmem>>, vector<1x512xf32>
    %17 = vector.broadcast %16 : vector<1x512xf32> to vector<16x512xf32>
    %18 = arith.addf %15, %17 : vector<16x512xf32>
    %cst_17 = arith.constant dense<0xFF800000> : vector<16xf32>
    %19 = vector.multi_reduction <maximumf>, %18, %cst_17 [1] : vector<16x512xf32> to vector<16xf32>
    %20 = vector.shape_cast %19 : vector<16xf32> to vector<16x1xf32>
    %21 = vector.broadcast %20 : vector<16x1xf32> to vector<16x512xf32>
    %22 = arith.subf %18, %21 : vector<16x512xf32>
    %23 = math.exp %22 : vector<16x512xf32>
    %cst_18 = arith.constant dense<0.000000e+00> : vector<16xf32>
    %24 = vector.multi_reduction <add>, %23, %cst_18 [1] : vector<16x512xf32> to vector<16xf32>
    %25 = vector.shape_cast %24 : vector<16xf32> to vector<16x1xf32>
    %26 = math.log %25 : vector<16x1xf32>
    %27 = vector.broadcast %26 : vector<16x1xf32> to vector<16x512xf32>
    %28 = arith.subf %22, %27 : vector<16x512xf32>
    %c0_19 = arith.constant 0 : index
    %c0_20 = arith.constant 0 : index
    %29 = vector.load %arg9[%c0_19, %c0_20] : memref<16x512xf32, #tpu.memory_space<vmem>>, vector<16x512xf32>
    tpu.vector_store %arg9[%c0_19, %c0_20], %28 {strides = array<i32>} : memref<16x512xf32, #tpu.memory_space<vmem>>, vector<16x512xf32>,
    return
  }
  func.func @transform_0(%arg0: i32) -> (i32, i32) {
    %c0_i32 = arith.constant 0 : i32
    %c0_i32_0 = arith.constant 0 : i32
    return %arg0, %c0_i32 : i32, i32
  }
  func.func @transform_1(%arg0: i32) -> (i32, i32) {
    %c0_i32 = arith.constant 0 : i32
    %c0_i32_0 = arith.constant 0 : i32
    return %arg0, %c0_i32 : i32, i32
  }
  func.func @transform_2(%arg0: i32) -> (i32, i32) {
    %c0_i32 = arith.constant 0 : i32
    %c0_i32_0 = arith.constant 0 : i32
    %c0_i32_1 = arith.constant 0 : i32
    return %c0_i32, %c0_i32_0 : i32, i32
  }
  func.func @transform_3(%arg0: i32) -> (i32, i32) {
    %c0_i32 = arith.constant 0 : i32
    %c0_i32_0 = arith.constant 0 : i32
    %c0_i32_1 = arith.constant 0 : i32
    return %c0_i32, %c0_i32_0 : i32, i32
  }
  func.func @transform_4(%arg0: i32) -> (i32, i32) {
    %c0_i32 = arith.constant 0 : i32
    %c0_i32_0 = arith.constant 0 : i32
    %c0_i32_1 = arith.constant 0 : i32
    return %c0_i32, %c0_i32_0 : i32, i32
  }
  func.func @transform_5(%arg0: i32) -> (i32, i32) {
    %c0_i32 = arith.constant 0 : i32
    %c0_i32_0 = arith.constant 0 : i32
    %c0_i32_1 = arith.constant 0 : i32
    return %c0_i32, %c0_i32_0 : i32, i32
  }
  func.func @transform_6(%arg0: i32) -> (i32, i32) {
    %c0_i32 = arith.constant 0 : i32
    %c0_i32_0 = arith.constant 0 : i32
    %c0_i32_1 = arith.constant 0 : i32
    return %c0_i32, %c0_i32_0 : i32, i32
  }
  func.func @transform_7(%arg0: i32) -> (i32, i32) {
    %c0_i32 = arith.constant 0 : i32
    %c0_i32_0 = arith.constant 0 : i32
    %c0_i32_1 = arith.constant 0 : i32
    return %c0_i32, %c0_i32_0 : i32, i32
  }
  func.func @transform_8(%arg0: i32) -> (i32, i32) {
    %c0_i32 = arith.constant 0 : i32
    %c0_i32_0 = arith.constant 0 : i32
    return %arg0, %c0_i32 : i32, i32
  }
}

</mosaic_0001>

<bundles_post_ra>
// kernel: tpu_custom_call.1
= control target key start
LH: loop header
LB: loop body
LE: loop exit
PB: predicated region body
PF: predicated region fallthrough
CT: control target
= control target key end

     0   :  { %13 = vsyncpa [#allocation3], 0  ;;  %s2309_s0 = inlined_call_operand.hbm [shape: bf16[16,32], index: 0, kind: input, shape index: {}]   ;;  %s2310_s1 = inlined_call_operand.hbm [shape: bf16[16,768], index: 1, kind: input, shape index: {}]   ;;  %s2311_s2 = inlined_call_operand.hbm [shape: bf16[32,256], index: 2, kind: input, shape index: {}]   ;;  %s2312_s3 = inlined_call_operand.vmem [shape: f32[1,256], index: 3, kind: input, shape index: {}]   ;;  %s2313_s4 = inlined_call_operand.hbm [shape: bf16[768,256], index: 4, kind: input, shape index: {}]   ;;  %s2314_s5 = inlined_call_operand.vmem [shape: f32[1,256], index: 5, kind: input, shape index: {}]   ;;  %s2315_s6 = inlined_call_operand.hbm [shape: bf16[256,512], index: 6, kind: input, shape index: {}]   ;;  %s2316_s7 = inlined_call_operand.vmem [shape: f32[1,512], index: 7, kind: input, shape index: {}]   ;;  %s2317_s8 = inlined_call_operand.hbm [shape: f32[16,512], index: 8, kind: output, shape index: {}]  }
   0x1   :  { %14 = vsyncpa [#allocation6], 0 }
   0x2   :  { %15 = vsyncpa [#allocation9], 0 }
   0x3   :  { %16 = vsyncpa [#allocation4], 0  ;;  %s2140_s27 = smov [#allocation5]   ;;  %s2000_s9 = scalar_lea.hbm %s2310_s1, 768 }
   0x4   :  { %s34_s28 = sshll.u32 %s2140_s27, 4  ;;  %p2001_p0 = scmp.ne.s32.totalorder %s2310_s1, %s2000_s9  ;;  %s35_s28 = int_to_ptr.vmem [resolvable:$true] %s34_s28 }
   0x5   :  { %p2004_p1 = scmp.lt.u32.totalorder %s2000_s9, %s2310_s1 }
   0x7   :  { %p2006_p2 = pnand %p2004_p1, %p2001_p0 }
   0x9   :  { %2009 = shalt.err (!%p2006_p2)
}
   0xa   :  { %s2010_s14 = scalar_lea.vmem %s35_s28, 768  ;;  %p2015_p4 = scmp.lt.s32.totalorder %s35_s28, %s35_s28 }
   0xb   :  { %p2011_p3 = scmp.ne.s32.totalorder %s35_s28, %s2010_s14  ;;  %p2016_p5 = scmp.lt.s32.totalorder %s2010_s14, %s2010_s14 }
   0xd   :  { %p2017_p6 = por %p2016_p5, %p2015_p4 }
   0xf   :  { %p2018_p7 = pnand %p2017_p6, %p2011_p3 }
  0x11   :  { %2021 = shalt.err (!%p2018_p7)
}
  0x12   :  { %s2141_s15 = smov 384   ;;  %s2142_s16 = smov 24  }
  0x13   :  { %40 = dma.hbm_to_vmem [thread:$0]  %s2310_s1, 768, %s35_s28, [#allocation6], %s2141_s15, %s2141_s15, %s2142_s16  }
  0x14   :  { %s2143_s19 = smov [#allocation8]   ;;  %s2144_s21 = smov [#allocation2]  }
  0x15   :  { %s60_s20 = sshll.u32 %s2143_s19, 4  ;;  %s22_s22 = sshll.u32 %s2144_s21, 4  ;;  %s61_s20 = int_to_ptr.vmem [resolvable:$true] %s60_s20  ;;  %s23_s22 = int_to_ptr.vmem [resolvable:$true] %s22_s22 }
  0x16   :  { %s2022_s25 = scalar_lea.hbm %s2313_s4, 12288 }
  0x17   :  { %p2023_p8 = scmp.ne.s32.totalorder %s2313_s4, %s2022_s25  ;;  %p2026_p9 = scmp.lt.u32.totalorder %s2022_s25, %s2313_s4 }
  0x19   :  { %p2028_p10 = pnand %p2026_p9, %p2023_p8 }
  0x1b   :  { %2031 = shalt.err (!%p2028_p10)
}
  0x1c   :  { %s2032_s1 = scalar_lea.vmem %s61_s20, 12288  ;;  %p2037_p12 = scmp.lt.s32.totalorder %s61_s20, %s61_s20 }
  0x1d   :  { %p2033_p11 = scmp.ne.s32.totalorder %s61_s20, %s2032_s1  ;;  %p2038_p13 = scmp.lt.s32.totalorder %s2032_s1, %s2032_s1 }
  0x1f   :  { %p2039_p0 = por %p2038_p13, %p2037_p12 }
  0x21   :  { %p2040_p1 = pnand %p2039_p0, %p2033_p11 }
  0x23   :  { %2043 = shalt.err (!%p2040_p1)
}
  0x24   :  { %s2145_s28 = smov 128   ;;  %s2146_s9 = smov 8  }
  0x25   :  { %66 = dma.hbm_to_vmem [thread:$0]  %s2313_s4, 12288, %s61_s20, [#allocation9], %s2145_s28, %s2145_s28, %s2146_s9  }
  0x26   :  { %s2044_s14 = scalar_lea.hbm %s2309_s0, 128 }
  0x27   :  { %p2045_p2 = scmp.ne.s32.totalorder %s2309_s0, %s2044_s14  ;;  %p2048_p3 = scmp.lt.u32.totalorder %s2044_s14, %s2309_s0 }
  0x29   :  { %p2050_p4 = pnand %p2048_p3, %p2045_p2 }
  0x2b   :  { %2053 = shalt.err (!%p2050_p4)
}
  0x2c   :  { %s2054_s19 = scalar_lea.vmem %s23_s22, 128  ;;  %p2059_p6 = scmp.lt.s32.totalorder %s23_s22, %s23_s22 }
  0x2d   :  { %p2055_p5 = scmp.ne.s32.totalorder %s23_s22, %s2054_s19  ;;  %p2060_p7 = scmp.lt.s32.totalorder %s2054_s19, %s2054_s19 }
  0x2f   :  { %p2061_p8 = por %p2060_p7, %p2059_p6 }
  0x31   :  { %p2062_p9 = pnand %p2061_p8, %p2055_p5 }
  0x33   :  { %2065 = shalt.err (!%p2062_p9)
}
  0x34   :  { %s2147_s4 = smov 64   ;;  %s2148_s20 = smov 4  }
  0x35   :  { %28 = dma.hbm_to_vmem [thread:$0]  %s2309_s0, 128, %s23_s22, [#allocation3], %s2147_s4, %s2147_s4, %s2148_s20  }
  0x36   :  { %s2149_s24 = smov [#allocation7]   ;;  %s2150_s26 = smov [#allocation10]  }
  0x37   :  { %s46_s25 = sshll.u32 %s2149_s24, 4  ;;  %s74_s27 = sshll.u32 %s2150_s26, 4  ;;  %s47_s25 = int_to_ptr.vmem [resolvable:$true] %s46_s25  ;;  %s75_s27 = int_to_ptr.vmem [resolvable:$true] %s74_s27 }
  0x38   :  { %s2066_s1 = scalar_lea.hbm %s2311_s2, 512 }
  0x39   :  { %p2067_p10 = scmp.ne.s32.totalorder %s2311_s2, %s2066_s1  ;;  %p2070_p11 = scmp.lt.u32.totalorder %s2066_s1, %s2311_s2 }
  0x3b   :  { %p2072_p12 = pnand %p2070_p11, %p2067_p10 }
  0x3d   :  { %2075 = shalt.err (!%p2072_p12)
}
  0x3e   :  { %s2076_s0 = scalar_lea.vmem %s47_s25, 512  ;;  %p2081_p0 = scmp.lt.s32.totalorder %s47_s25, %s47_s25 }
  0x3f   :  { %p2077_p13 = scmp.ne.s32.totalorder %s47_s25, %s2076_s0  ;;  %p2082_p1 = scmp.lt.s32.totalorder %s2076_s0, %s2076_s0 }
  0x41   :  { %p2083_p2 = por %p2082_p1, %p2081_p0 }
  0x43   :  { %p2084_p3 = pnand %p2083_p2, %p2077_p13 }
  0x45   :  { %2087 = shalt.err (!%p2084_p3)
}
  0x46   :  { %52 = dma.hbm_to_vmem [thread:$0]  %s2311_s2, 512, %s47_s25, [#allocation6], %s2145_s28, %s2145_s28, %s2146_s9  }
  0x47   :  { %s2088_s17 = scalar_lea.hbm %s2315_s6, 8192 }
  0x48   :  { %p2089_p4 = scmp.ne.s32.totalorder %s2315_s6, %s2088_s17  ;;  %p2092_p5 = scmp.lt.u32.totalorder %s2088_s17, %s2315_s6 }
  0x4a   :  { %p2094_p6 = pnand %p2092_p5, %p2089_p4 }
  0x4c   :  { %2097 = shalt.err (!%p2094_p6)
}
  0x4d   :  { %s2098_s21 = scalar_lea.vmem %s75_s27, 8192  ;;  %p2103_p8 = scmp.lt.s32.totalorder %s75_s27, %s75_s27 }
  0x4e   :  { %p2099_p7 = scmp.ne.s32.totalorder %s75_s27, %s2098_s21  ;;  %p2104_p9 = scmp.lt.s32.totalorder %s2098_s21, %s2098_s21 }
  0x50   :  { %p2105_p10 = por %p2104_p9, %p2103_p8 }
  0x52   :  { %p2106_p11 = pnand %p2105_p10, %p2099_p7 }
  0x54   :  { %2109 = shalt.err (!%p2106_p11)
}
  0x55   :  { %s2151_s2 = smov 256   ;;  %s2152_s28 = smov 16  }
  0x56   :  { %80 = dma.hbm_to_vmem [thread:$0]  %s2315_s6, 8192, %s75_s27, [#allocation9], %s2151_s2, %s2151_s2, %s2152_s28  }
  0x57   :  { %2132 = dma.done.wait [#allocation3], 128  }
  0x58   :  { %2133 = vsyncadd [#allocation3], 4294967168 }
  0x59   :  { %2134 = dma.done.wait [#allocation6], 1280  }
  0x5a   :  { %2135 = vsyncadd [#allocation6], 4294966016 }
  0x5b   :  { %2136 = dma.done.wait [#allocation9], 20480  }
  0x5c   :  { %2137 = vsyncadd [#allocation9], 4294946816  ;;  %v1724_v0 = vld [vmem:[#allocation8 + $0x4] ss:$8 sps:$4 sm:$0xff]   ;;  %v1726_v1 = vld [vmem:[#allocation8] ss:$8 sps:$4 sm:$0xff]  }
  0x5d   :  { %813 = vmatprep.subr.bf16.mxu1 %v1724_v0  ;;  %v1727_v2 = vld [vmem:[#allocation8 + $0x14] ss:$8 sps:$4 sm:$0xff]   ;;  %v1729_v3 = vld [vmem:[#allocation8 + $0x10] ss:$8 sps:$4 sm:$0xff]   ;;  %v1730_v4 = vld [vmem:[#allocation8 + $0x24] ss:$8 sps:$4 sm:$0xff]  }
  0x5e   :  { %814 = vmatpush1.bf16.msra.mxu1 %v1726_v1  ;;  %v1732_v5 = vld [vmem:[#allocation8 + $0x20] ss:$8 sps:$4 sm:$0xff]   ;;  %v1733_v6 = vld [vmem:[#allocation8 + $0x34] ss:$8 sps:$4 sm:$0xff]   ;;  %v1735_v7 = vld [vmem:[#allocation8 + $0x30] ss:$8 sps:$4 sm:$0xff]  }
  0x5f   :  { %815 = vmatprep.subr.bf16.mxu1 %v1727_v2  ;;  %v1736_v8 = vld [vmem:[#allocation8 + $0x44] ss:$8 sps:$4 sm:$0xff]   ;;  %v1738_v9 = vld [vmem:[#allocation8 + $0x40] ss:$8 sps:$4 sm:$0xff]   ;;  %v1739_v10 = vld [vmem:[#allocation8 + $0x54] ss:$8 sps:$4 sm:$0xff]  }
  0x60   :  { %v1741_v11 = vld [vmem:[#allocation8 + $0x50] ss:$8 sps:$4 sm:$0xff]   ;;  %v1742_v12 = vld [vmem:[#allocation8 + $0x64] ss:$8 sps:$4 sm:$0xff]   ;;  %v1744_v14 = vld [vmem:[#allocation8 + $0x60] ss:$8 sps:$4 sm:$0xff]  }
  0x61   :  { %v1774_v13 = vld [vmem:[#allocation5 + $0x4] ss:$24 sps:$4 sm:$0xff]   ;;  %v1747_v16 = vld [vmem:[#allocation8 + $0x70] ss:$8 sps:$4 sm:$0xff]   ;;  %v1750_v18 = vld [vmem:[#allocation8 + $0x80] ss:$8 sps:$4 sm:$0xff]  }
  0x62   :  { %816 = vmatpush1.bf16.msra.mxu1 %v1729_v3  ;;  %v1745_v15 = vld [vmem:[#allocation8 + $0x74] ss:$8 sps:$4 sm:$0xff]   ;;  %845 = vmatprep.mubr.bf16.mxu1 %v1774_v13  ;;  %v1748_v17 = vld [vmem:[#allocation8 + $0x84] ss:$8 sps:$4 sm:$0xff]   ;;  %v1753_v20 = vld [vmem:[#allocation8 + $0x90] ss:$8 sps:$4 sm:$0xff]  }
  0x63   :  { %817 = vmatprep.subr.bf16.mxu1 %v1730_v4  ;;  %v1751_v19 = vld [vmem:[#allocation8 + $0x94] ss:$8 sps:$4 sm:$0xff]   ;;  %v1754_v21 = vld [vmem:[#allocation8 + $0xa4] ss:$8 sps:$4 sm:$0xff]   ;;  %v1756_v22 = vld [vmem:[#allocation8 + $0xa0] ss:$8 sps:$4 sm:$0xff]  }
  0x64   :  { %v1757_v23 = vld [vmem:[#allocation8 + $0xb4] ss:$8 sps:$4 sm:$0xff]   ;;  %v1759_v24 = vld [vmem:[#allocation8 + $0xb0] ss:$8 sps:$4 sm:$0xff]   ;;  %v1760_v25 = vld [vmem:[#allocation8 + $0xc4] ss:$8 sps:$4 sm:$0xff]  }
  0x65   :  { %v1762_v26 = vld [vmem:[#allocation8 + $0xc0] ss:$8 sps:$4 sm:$0xff]   ;;  %v1763_v27 = vld [vmem:[#allocation8 + $0xd4] ss:$8 sps:$4 sm:$0xff]   ;;  %v1765_v28 = vld [vmem:[#allocation8 + $0xd0] ss:$8 sps:$4 sm:$0xff]  }
  0x66   :  { %818 = vmatpush1.bf16.msra.mxu1 %v1732_v5  ;;  %v1766_v29 = vld [vmem:[#allocation8 + $0xe4] ss:$8 sps:$4 sm:$0xff]   ;;  %v1768_v30 = vld [vmem:[#allocation8 + $0xe0] ss:$8 sps:$4 sm:$0xff]   ;;  %v1769_v31 = vld [vmem:[#allocation8 + $0xf4] ss:$8 sps:$4 sm:$0xff]  }
  0x67   :  { %819 = vmatprep.subr.bf16.mxu1 %v1733_v6  ;;  %v1771_v32 = vld [vmem:[#allocation8 + $0xf0] ss:$8 sps:$4 sm:$0xff]   ;;  %v1777_v33 = vld [vmem:[#allocation8 + $0x104] ss:$8 sps:$4 sm:$0xff]   ;;  %v2153_v34 = vmov 0   ;;  %vm142_vm0 = vcmask 261120  }
  0x68   :  { %178 = vmatprep.mubr.bf16.mxu0 %v2153_v34  ;;  %v1772_v35 = vld [vmem:[#allocation5] ss:$24 sps:$4 sm:$0xff]   ;;  %v1780_v37 = vld [vmem:[#allocation8 + $0x114] ss:$8 sps:$4 sm:$0xff]   ;;  %v1868_v39 = vld [vmem:[#allocation7 + $0x4] ss:$8 sps:$4 sm:$0xff]  }
  0x69   :  { %v1775_v36 = vld [vmem:[#allocation8 + $0x100] ss:$8 sps:$4 sm:$0xff]   ;;  %v1825_v38 = vld [vmem:[#allocation5 + $0xc] ss:$24 sps:$4 sm:$0xff]   ;;  %v1778_v41 = vld [vmem:[#allocation8 + $0x110] ss:$8 sps:$4 sm:$0xff]   ;;  %146 = vmatprep.subr.bf16.mxu0 %v1868_v39 }
  0x6a   :  { %820 = vmatpush1.bf16.msra.mxu1 %v1735_v7  ;;  %v1870_v40 = vld [vmem:[#allocation7] ss:$8 sps:$4 sm:$0xff]   ;;  %v1783_v42 = vld [vmem:[#allocation8 + $0x124] ss:$8 sps:$4 sm:$0xff]   ;;  %v1874_v43 = vld [vmem:[#allocation7 + $0x14] ss:$8 sps:$4 sm:$0xff]  }
  0x6b   :  { %821 = vmatprep.subr.bf16.mxu1 %v1736_v8  ;;  %147 = vmatpush1.bf16.msra.mxu0 %v1870_v40  ;;  %v1876_v44 = vld [vmem:[#allocation7 + $0x10] ss:$8 sps:$4 sm:$0xff]   ;;  %v1781_v45 = vld [vmem:[#allocation8 + $0x120] ss:$8 sps:$4 sm:$0xff]   ;;  %v1786_v46 = vld [vmem:[#allocation8 + $0x134] ss:$8 sps:$4 sm:$0xff]  }
  0x6c   :  { %148 = vmatprep.subr.bf16.mxu0 %v1874_v43  ;;  %v1880_v47 = vld [vmem:[#allocation2] sm:$0xff]   ;;  %v1884_v48 = vld [vmem:[#allocation10] ss:$16 sps:$4 sm:$0xff]   ;;  %v1886_v49 = vld [vmem:[#allocation10 + $0x4] ss:$16 sps:$4 sm:$0xff]  }
  0x6d   :  { %v1889_v50 = vld [vmem:[#allocation10 + $0x24] ss:$16 sps:$4 sm:$0xff]   ;;  %v1784_v51 = vld [vmem:[#allocation8 + $0x130] ss:$8 sps:$4 sm:$0xff]   ;;  %v1787_v55 = vld [vmem:[#allocation8 + $0x140] ss:$8 sps:$4 sm:$0xff]  }
  0x6e   :  { %822 = vmatpush1.bf16.msra.mxu1 %v1738_v9  ;;  %v1789_v52 = vld [vmem:[#allocation8 + $0x144] ss:$8 sps:$4 sm:$0xff]   ;;  %v1887_v53 = vld [vmem:[#allocation10 + $0x20] ss:$16 sps:$4 sm:$0xff]   ;;  %v1792_v56 = vld [vmem:[#allocation8 + $0x154] ss:$8 sps:$4 sm:$0xff]  }
  0x6f   :  { %823 = vmatprep.subr.bf16.mxu1 %v1739_v10  ;;  %149 = vmatpush1.bf16.msra.mxu0 %v1876_v44  ;;  %v1892_v54 = vld [vmem:[#allocation10 + $0x44] ss:$16 sps:$4 sm:$0xff]   ;;  %v1890_v57 = vld [vmem:[#allocation10 + $0x40] ss:$16 sps:$4 sm:$0xff]  }
  0x70   :  { %1354 = vmatprep.subr.bf16.mxu0 %v1886_v49  ;;  %v1895_v58 = vld [vmem:[#allocation10 + $0x64] ss:$16 sps:$4 sm:$0xff]   ;;  %v1790_v59 = vld [vmem:[#allocation8 + $0x150] ss:$8 sps:$4 sm:$0xff]   ;;  %v1793_v63 = vld [vmem:[#allocation8 + $0x160] ss:$8 sps:$4 sm:$0xff]  }
  0x71   :  { %v1795_v60 = vld [vmem:[#allocation8 + $0x164] ss:$8 sps:$4 sm:$0xff]   ;;  %v1893_v61 = vld [vmem:[#allocation10 + $0x60] ss:$16 sps:$4 sm:$0xff]   ;;  %v1798_v0 = vld [vmem:[#allocation8 + $0x174] ss:$8 sps:$4 sm:$0xff]  }
  0x72   :  { %824 = vmatpush1.bf16.msra.mxu1 %v1741_v11  ;;  %1528 = vmatmul.mubr.msk.bf16.vlgmr.msra.gmra.mrb[0].mxu0 %vm142_vm0, %v1880_v47  ;;  %v1898_v62 = vld [vmem:[#allocation10 + $0x84] ss:$16 sps:$4 sm:$0xff]   ;;  %v1896_v1 = vld [vmem:[#allocation10 + $0x80] ss:$16 sps:$4 sm:$0xff]  }
  0x73   :  { %825 = vmatprep.subr.bf16.mxu1 %v1742_v12  ;;  %1355 = vmatpush1.bf16.msra.mxu0 %v1884_v48  ;;  %v1796_v2 = vld [vmem:[#allocation8 + $0x170] ss:$8 sps:$4 sm:$0xff]   ;;  %v1901_v3 = vld [vmem:[#allocation10 + $0xa4] ss:$16 sps:$4 sm:$0xff]   ;;  %v1799_v7 = vld [vmem:[#allocation8 + $0x180] ss:$8 sps:$4 sm:$0xff]  }
  0x74   :  { %1356 = vmatprep.subr.bf16.mxu0 %v1889_v50  ;;  %v1801_v4 = vld [vmem:[#allocation8 + $0x184] ss:$8 sps:$4 sm:$0xff]   ;;  %v1899_v5 = vld [vmem:[#allocation10 + $0xa0] ss:$16 sps:$4 sm:$0xff]   ;;  %v1804_v8 = vld [vmem:[#allocation8 + $0x194] ss:$8 sps:$4 sm:$0xff]  }
  0x75   :  { %v1904_v6 = vld [vmem:[#allocation10 + $0xc4] ss:$16 sps:$4 sm:$0xff]   ;;  %v1902_v9 = vld [vmem:[#allocation10 + $0xc0] ss:$16 sps:$4 sm:$0xff]  }
  0x76   :  { %826 = vmatpush1.bf16.msra.mxu1 %v1744_v14  ;;  %v1907_v10 = vld [vmem:[#allocation10 + $0xe4] ss:$16 sps:$4 sm:$0xff]   ;;  %v1802_v11 = vld [vmem:[#allocation8 + $0x190] ss:$8 sps:$4 sm:$0xff]   ;;  %v1844_v50 = vld [vmem:[#allocation8 + $0x260] ss:$8 sps:$4 sm:$0xff]  }
  0x77   :  { %827 = vmatprep.subr.bf16.mxu1 %v1745_v15  ;;  %1357 = vmatpush1.bf16.msra.mxu0 %v1887_v53  ;;  %v1807_v12 = vld [vmem:[#allocation8 + $0x1a4] ss:$8 sps:$4 sm:$0xff]   ;;  %v1905_v13 = vld [vmem:[#allocation10 + $0xe0] ss:$16 sps:$4 sm:$0xff]   ;;  %v1831_v39 = vld [vmem:[#allocation8 + $0x214] ss:$8 sps:$4 sm:$0xff]  }
  0x78   :  { %1358 = vmatprep.subr.bf16.mxu0 %v1892_v54  ;;  %v1910_v14 = vld [vmem:[#allocation10 + $0x104] ss:$16 sps:$4 sm:$0xff]   ;;  %v1805_v15 = vld [vmem:[#allocation8 + $0x1a0] ss:$8 sps:$4 sm:$0xff]   ;;  %v1820_v34 = vld [vmem:[#allocation8 + $0x1f0] ss:$8 sps:$4 sm:$0xff]  }
  0x79   :  { %v1829_v40 = vld [vmem:[#allocation8 + $0x210] ss:$8 sps:$4 sm:$0xff]   ;;  %v1837_v43 = vld [vmem:[#allocation8 + $0x234] ss:$8 sps:$4 sm:$0xff]   ;;  %v1846_v49 = vld [vmem:[#allocation8 + $0x264] ss:$8 sps:$4 sm:$0xff]  }
  0x7a   :  { %828 = vmatpush1.bf16.msra.mxu1 %v1747_v16  ;;  %v1810_v16 = vld [vmem:[#allocation8 + $0x1b4] ss:$8 sps:$4 sm:$0xff]   ;;  %v1835_v44 = vld [vmem:[#allocation8 + $0x230] ss:$8 sps:$4 sm:$0xff]   ;;  %v1852_v53 = vld [vmem:[#allocation8 + $0x284] ss:$8 sps:$4 sm:$0xff]  }
  0x7b   :  { %829 = vmatprep.subr.bf16.mxu1 %v1748_v17  ;;  %1359 = vmatpush1.bf16.msra.mxu0 %v1890_v57  ;;  %v1908_v17 = vld [vmem:[#allocation10 + $0x100] ss:$16 sps:$4 sm:$0xff]   ;;  %v1843_v47 = vld [vmem:[#allocation8 + $0x254] ss:$8 sps:$4 sm:$0xff]  }
  0x7c   :  { %1360 = vmatprep.subr.bf16.mxu0 %v1895_v58  ;;  %v1841_v48 = vld [vmem:[#allocation8 + $0x250] ss:$8 sps:$4 sm:$0xff]   ;;  %v1850_v54 = vld [vmem:[#allocation8 + $0x280] ss:$8 sps:$4 sm:$0xff]   ;;  %v1925_v57 = vld [vmem:[#allocation10 + $0x1a4] ss:$16 sps:$4 sm:$0xff]  }
  0x7d   :  { %v1853_v58 = vld [vmem:[#allocation8 + $0x290] ss:$8 sps:$4 sm:$0xff]  }
  0x7e   :  { %830 = vmatpush1.bf16.msra.mxu1 %v1750_v18  ;;  %v1913_v18 = vld [vmem:[#allocation10 + $0x124] ss:$16 sps:$4 sm:$0xff]  }
  0x7f   :  { %831 = vmatprep.subr.bf16.mxu1 %v1751_v19  ;;  %1361 = vmatpush1.bf16.msra.mxu0 %v1893_v61  ;;  %v1808_v19 = vld [vmem:[#allocation8 + $0x1b0] ss:$8 sps:$4 sm:$0xff]   ;;  %v1861_v61 = vld [vmem:[#allocation8 + $0x2b4] ss:$8 sps:$4 sm:$0xff]  }
  0x80   :  { %1362 = vmatprep.subr.bf16.mxu0 %v1898_v62  ;;  %v1859_v62 = vld [vmem:[#allocation8 + $0x2b0] ss:$8 sps:$4 sm:$0xff]  }
  0x82   :  { %832 = vmatpush1.bf16.msra.mxu1 %v1753_v20  ;;  %v1813_v20 = vld [vmem:[#allocation8 + $0x1c4] ss:$8 sps:$4 sm:$0xff]  }
  0x83   :  { %833 = vmatprep.subr.bf16.mxu1 %v1754_v21  ;;  %1363 = vmatpush1.bf16.msra.mxu0 %v1896_v1  ;;  %v1911_v21 = vld [vmem:[#allocation10 + $0x120] ss:$16 sps:$4 sm:$0xff]   ;;  %v1867_v1 = vld [vmem:[#allocation8 + $0x2d4] ss:$8 sps:$4 sm:$0xff]  }
  0x84   :  { %1364 = vmatprep.subr.bf16.mxu0 %v1901_v3  ;;  %v1873_v3 = vld [vmem:[#allocation8 + $0x2e4] ss:$8 sps:$4 sm:$0xff]  }
  0x86   :  { %834 = vmatpush1.bf16.msra.mxu1 %v1756_v22  ;;  %v1916_v22 = vld [vmem:[#allocation10 + $0x144] ss:$16 sps:$4 sm:$0xff]  }
  0x87   :  { %835 = vmatprep.subr.bf16.mxu1 %v1757_v23  ;;  %1365 = vmatpush1.bf16.msra.mxu0 %v1899_v5  ;;  %v1811_v23 = vld [vmem:[#allocation8 + $0x1c0] ss:$8 sps:$4 sm:$0xff]   ;;  %v1879_v5 = vld [vmem:[#allocation8 + $0x2f4] ss:$8 sps:$4 sm:$0xff]  }
  0x88   :  { %1366 = vmatprep.subr.bf16.mxu0 %v1904_v6  ;;  %v1877_v6 = vld [vmem:[#allocation8 + $0x2f0] ss:$8 sps:$4 sm:$0xff]  }
  0x8a   :  { %836 = vmatpush1.bf16.msra.mxu1 %v1759_v24  ;;  %v1816_v24 = vld [vmem:[#allocation8 + $0x1d4] ss:$8 sps:$4 sm:$0xff]  }
  0x8b   :  { %837 = vmatprep.subr.bf16.mxu1 %v1760_v25  ;;  %1367 = vmatpush1.bf16.msra.mxu0 %v1902_v9  ;;  %v1914_v25 = vld [vmem:[#allocation10 + $0x140] ss:$16 sps:$4 sm:$0xff]  }
  0x8c   :  { %1368 = vmatprep.subr.bf16.mxu0 %v1907_v10  ;;  %v1926_v9 = vld [vmem:[#allocation10 + $0x1c0] ss:$16 sps:$4 sm:$0xff]   ;;  %v1931_v10 = vld [vmem:[#allocation10 + $0x1e4] ss:$16 sps:$4 sm:$0xff]  }
  0x8e   :  { %838 = vmatpush1.bf16.msra.mxu1 %v1762_v26  ;;  %v1919_v26 = vld [vmem:[#allocation10 + $0x164] ss:$16 sps:$4 sm:$0xff]  }
  0x8f   :  { %839 = vmatprep.subr.bf16.mxu1 %v1763_v27  ;;  %1369 = vmatpush1.bf16.msra.mxu0 %v1905_v13  ;;  %v1814_v27 = vld [vmem:[#allocation8 + $0x1d0] ss:$8 sps:$4 sm:$0xff]  }
  0x90   :  { %1370 = vmatprep.subr.bf16.mxu0 %v1910_v14 }
  0x92   :  { %840 = vmatpush1.bf16.msra.mxu1 %v1765_v28  ;;  %v1819_v28 = vld [vmem:[#allocation8 + $0x1e4] ss:$8 sps:$4 sm:$0xff]  }
  0x93   :  { %841 = vmatprep.subr.bf16.mxu1 %v1766_v29  ;;  %1371 = vmatpush1.bf16.msra.mxu0 %v1908_v17  ;;  %v1917_v29 = vld [vmem:[#allocation10 + $0x160] ss:$16 sps:$4 sm:$0xff]   ;;  %v107_v17 = vlaneseq }
  0x94   :  { %1372 = vmatprep.subr.bf16.mxu0 %v1913_v18 }
  0x95   :  { %v2268_v18 = vshrl.u32 %v107_v17, 7  ;;  %v1012_v17 = vld [vmem:[%s2316_s7] sm:$0xf]  ;;  %s2154_s7 = smov [#allocation11]  }
  0x96   :  { %842 = vmatpush1.bf16.msra.mxu1 %v1768_v30  ;;  %v1922_v30 = vld [vmem:[#allocation10 + $0x184] ss:$16 sps:$4 sm:$0xff]   ;;  %s1509_s27 = sshll.u32 %s2154_s7, 4  ;;  %s1510_s27 = int_to_ptr.vmem [resolvable:$true] %s1509_s27 }
  0x97   :  { %843 = vmatprep.subr.bf16.mxu1 %v1769_v31  ;;  %1373 = vmatpush1.bf16.msra.mxu0 %v1911_v21  ;;  %v1817_v31 = vld [vmem:[#allocation8 + $0x1e0] ss:$8 sps:$4 sm:$0xff]   ;;  %v2277_v21 = vsub.s32 1, %v2268_v18  ;;  %s2110_s29 = scalar_lea.vmem %s1510_s27, 1024  ;;  %p2115_p13 = scmp.lt.s32.totalorder %s1510_s27, %s1510_s27 }
  0x98   :  { %1374 = vmatprep.subr.bf16.mxu0 %v1916_v22  ;;  %v291_v22 = vld [vmem:[%s2314_s5] sm:$0x3]  ;;  %p2111_p12 = scmp.ne.s32.totalorder %s1510_s27, %s2110_s29  ;;  %p2116_p0 = scmp.lt.s32.totalorder %s2110_s29, %s2110_s29 }
  0x9a   :  { %844 = vmatpush1.bf16.msra.mxu1 %v1771_v32  ;;  %v1822_v32 = vld [vmem:[#allocation8 + $0x1f4] ss:$8 sps:$4 sm:$0xff]   ;;  %p2117_p1 = por %p2116_p0, %p2115_p13 }
  0x9b   :  { %856 = vmatprep.subr.bf16.mxu1 %v1777_v33  ;;  %1375 = vmatpush1.bf16.msra.mxu0 %v1914_v25  ;;  %v1920_v33 = vld [vmem:[#allocation10 + $0x180] ss:$16 sps:$4 sm:$0xff]  }
  0x9c   :  { %1376 = vmatprep.subr.bf16.mxu0 %v1919_v26  ;;  %v300_v26 = vrot.slane %v291_v22, %v2277_v21  ;;  %p2118_p2 = pnand %p2117_p1, %p2111_p12 }
  0x9d   :  { %846 = vmatmul.mubr.bf16.vlgmr.msra.gmra.mrb[0].mxu1 %v1772_v35  ;;  %v1828_v35 = vld [vmem:[#allocation8 + $0x204] ss:$8 sps:$4 sm:$0xff]  }
  0x9e   :  { %857 = vmatpush1.bf16.msra.mxu1 %v1775_v36  ;;  %888 = vmatprep.mubr.bf16.mxu1 %v1825_v38  ;;  %v1823_v36 = vld [vmem:[#allocation5 + $0x8] ss:$24 sps:$4 sm:$0xff]   ;;  %v1883_v38 = vld [vmem:[#allocation5 + $0x14] ss:$24 sps:$4 sm:$0xff]  }
  0x9f   :  { %858 = vmatprep.subr.bf16.mxu1 %v1780_v37  ;;  %1377 = vmatpush1.bf16.msra.mxu0 %v1917_v29  ;;  %v1826_v37 = vld [vmem:[#allocation8 + $0x200] ss:$8 sps:$4 sm:$0xff]  }
  0xa0   :  { %1378 = vmatprep.subr.bf16.mxu0 %v1922_v30 }
  0xa2   :  { %859 = vmatpush1.bf16.msra.mxu1 %v1778_v41  ;;  %v1834_v41 = vld [vmem:[#allocation8 + $0x224] ss:$8 sps:$4 sm:$0xff]  }
  0xa3   :  { %860 = vmatprep.subr.bf16.mxu1 %v1783_v42  ;;  %1379 = vmatpush1.bf16.msra.mxu0 %v1920_v33  ;;  %v1832_v42 = vld [vmem:[#allocation8 + $0x220] ss:$8 sps:$4 sm:$0xff]  }
  0xa4   :  { %1380 = vmatprep.subr.bf16.mxu0 %v1925_v57  ;;  %v1950_v57 = vld [vmem:[#allocation10 + $0xc8] ss:$16 sps:$4 sm:$0xff]  }
  0xa6   :  { %861 = vmatpush1.bf16.msra.mxu1 %v1781_v45  ;;  %v1840_v45 = vld [vmem:[#allocation8 + $0x244] ss:$8 sps:$4 sm:$0xff]  }
  0xa7   :  { %862 = vmatprep.subr.bf16.mxu1 %v1786_v46  ;;  %v1838_v46 = vld [vmem:[#allocation8 + $0x240] ss:$8 sps:$4 sm:$0xff]  }
  0xaa   :  { %863 = vmatpush1.bf16.msra.mxu1 %v1784_v51  ;;  %v1849_v51 = vld [vmem:[#allocation8 + $0x274] ss:$8 sps:$4 sm:$0xff]  }
  0xab   :  { %864 = vmatprep.subr.bf16.mxu1 %v1789_v52  ;;  %v1847_v52 = vld [vmem:[#allocation8 + $0x270] ss:$8 sps:$4 sm:$0xff]  }
  0xae   :  { %865 = vmatpush1.bf16.msra.mxu1 %v1787_v55  ;;  %v1855_v55 = vld [vmem:[#allocation8 + $0x294] ss:$8 sps:$4 sm:$0xff]  }
  0xaf   :  { %866 = vmatprep.subr.bf16.mxu1 %v1792_v56  ;;  %v1923_v56 = vld [vmem:[#allocation10 + $0x1a0] ss:$16 sps:$4 sm:$0xff]  }
  0xb0   :  { %1381 = vmatpush1.bf16.msra.mxu0 %v1923_v56  ;;  %v1952_v56 = vld [vmem:[#allocation10 + $0xcc] ss:$16 sps:$4 sm:$0xff]  }
  0xb2   :  { %867 = vmatpush1.bf16.msra.mxu1 %v1790_v59  ;;  %v1858_v59 = vld [vmem:[#allocation8 + $0x2a4] ss:$8 sps:$4 sm:$0xff]  }
  0xb3   :  { %868 = vmatprep.subr.bf16.mxu1 %v1795_v60  ;;  %v1856_v60 = vld [vmem:[#allocation8 + $0x2a0] ss:$8 sps:$4 sm:$0xff]  }
  0xb6   :  { %869 = vmatpush1.bf16.msra.mxu1 %v1793_v63  ;;  %v1864_v63 = vld [vmem:[#allocation8 + $0x2c4] ss:$8 sps:$4 sm:$0xff]  }
  0xb7   :  { %870 = vmatprep.subr.bf16.mxu1 %v1798_v0  ;;  %v1862_v0 = vld [vmem:[#allocation8 + $0x2c0] ss:$8 sps:$4 sm:$0xff]  }
  0xba   :  { %871 = vmatpush1.bf16.msra.mxu1 %v1796_v2  ;;  %v1865_v2 = vld [vmem:[#allocation8 + $0x2d0] ss:$8 sps:$4 sm:$0xff]  }
  0xbb   :  { %872 = vmatprep.subr.bf16.mxu1 %v1801_v4  ;;  %v1871_v4 = vld [vmem:[#allocation8 + $0x2e0] ss:$8 sps:$4 sm:$0xff]  }
  0xbe   :  { %873 = vmatpush1.bf16.msra.mxu1 %v1799_v7  ;;  %v1881_v7 = vld [vmem:[#allocation5 + $0x10] ss:$24 sps:$4 sm:$0xff]  }
  0xbf   :  { %874 = vmatprep.subr.bf16.mxu1 %v1804_v8  ;;  %v1928_v8 = vld [vmem:[#allocation10 + $0x1c4] ss:$16 sps:$4 sm:$0xff]  }
  0xc0   :  { %1382 = vmatprep.subr.bf16.mxu0 %v1928_v8  ;;  %v1976_v8 = vld [vmem:[#allocation10 + $0x1cc] ss:$16 sps:$4 sm:$0xff]  }
  0xc1   :  { %1383 = vmatpush1.bf16.msra.mxu0 %v1926_v9  ;;  %v1974_v9 = vld [vmem:[#allocation10 + $0x1c8] ss:$16 sps:$4 sm:$0xff]  }
  0xc2   :  { %875 = vmatpush1.bf16.msra.mxu1 %v1802_v11  ;;  %v1929_v11 = vld [vmem:[#allocation10 + $0x1e0] ss:$16 sps:$4 sm:$0xff]   ;;  %1384 = vmatprep.subr.bf16.mxu0 %v1931_v10  ;;  %v1979_v10 = vld [vmem:[#allocation10 + $0x1ec] ss:$16 sps:$4 sm:$0xff]  }
  0xc3   :  { %876 = vmatprep.subr.bf16.mxu1 %v1807_v12  ;;  %v1934_v12 = vld [vmem:[#allocation10 + $0xc] ss:$16 sps:$4 sm:$0xff]  }
  0xc5   :  { %1385 = vmatpush1.bf16.msra.mxu0 %v1929_v11  ;;  %v1977_v11 = vld [vmem:[#allocation10 + $0x1e8] ss:$16 sps:$4 sm:$0xff]  }
  0xc6   :  { %877 = vmatpush1.bf16.msra.mxu1 %v1805_v15  ;;  %1397 = vmatprep.subr.bf16.mxu0 %v1934_v12 }
  0xc7   :  { %878 = vmatprep.subr.bf16.mxu1 %v1810_v16 }
  0xca   :  { %879 = vmatpush1.bf16.msra.mxu1 %v1808_v19  ;;  %v2271_v19 = vsub.s32 0, %v2268_v18 }
  0xcb   :  { %880 = vmatprep.subr.bf16.mxu1 %v1813_v20  ;;  %v105_v20 = vld [vmem:[%s2312_s3] sm:$0x3] }
  0xcc   :  { %v296_v25 = vrot.slane %v291_v22, %v2271_v19  ;;  %v1017_v22 = vrot.slane %v1012_v17, %v2271_v19 }
  0xce   :  { %881 = vmatpush1.bf16.msra.mxu1 %v1811_v23  ;;  %v110_v23 = vrot.slane %v105_v20, %v2271_v19 }
  0xcf   :  { %882 = vmatprep.subr.bf16.mxu1 %v1816_v24  ;;  %v114_v24 = vrot.slane %v105_v20, %v2277_v21  ;;  %v1028_v20 = vsub.s32 3, %v2268_v18 }
  0xd2   :  { %883 = vmatpush1.bf16.msra.mxu1 %v1814_v27 }
  0xd3   :  { %884 = vmatprep.subr.bf16.mxu1 %v1819_v28 }
  0xd6   :  { %885 = vmatpush1.bf16.msra.mxu1 %v1817_v31 }
  0xd7   :  { %886 = vmatprep.subr.bf16.mxu1 %v1822_v32 }
  0xda   :  { %887 = vmatpush1.bf16.msra.mxu1 %v1820_v34 }
  0xdb   :  { %899 = vmatprep.subr.bf16.mxu1 %v1828_v35 }
  0xdd   :  { %889 = vmatmul.mubr.bf16.vlgmr.msra.gmra.mrb[0].mxu1 %v1823_v36 }
  0xde   :  { %900 = vmatpush1.bf16.msra.mxu1 %v1826_v37  ;;  %931 = vmatprep.mubr.bf16.mxu1 %v1883_v38 }
  0xdf   :  { %901 = vmatprep.subr.bf16.mxu1 %v1831_v39 }
  0xe2   :  { %902 = vmatpush1.bf16.msra.mxu1 %v1829_v40 }
  0xe3   :  { %903 = vmatprep.subr.bf16.mxu1 %v1834_v41 }
  0xe6   :  { %904 = vmatpush1.bf16.msra.mxu1 %v1832_v42 }
  0xe7   :  { %905 = vmatprep.subr.bf16.mxu1 %v1837_v43 }
  0xea   :  { %906 = vmatpush1.bf16.msra.mxu1 %v1835_v44 }
  0xeb   :  { %907 = vmatprep.subr.bf16.mxu1 %v1840_v45  ;;  %v1932_v45 = vld [vmem:[#allocation10 + $0x8] ss:$16 sps:$4 sm:$0xff]  }
  0xee   :  { %908 = vmatpush1.bf16.msra.mxu1 %v1838_v46  ;;  %v1937_v46 = vld [vmem:[#allocation10 + $0x2c] ss:$16 sps:$4 sm:$0xff]  }
  0xef   :  { %909 = vmatprep.subr.bf16.mxu1 %v1843_v47  ;;  %v1935_v47 = vld [vmem:[#allocation10 + $0x28] ss:$16 sps:$4 sm:$0xff]  }
  0xf2   :  { %910 = vmatpush1.bf16.msra.mxu1 %v1841_v48  ;;  %v1940_v48 = vld [vmem:[#allocation10 + $0x4c] ss:$16 sps:$4 sm:$0xff]  }
  0xf3   :  { %911 = vmatprep.subr.bf16.mxu1 %v1846_v49  ;;  %v1938_v49 = vld [vmem:[#allocation10 + $0x48] ss:$16 sps:$4 sm:$0xff]  }
  0xf6   :  { %912 = vmatpush1.bf16.msra.mxu1 %v1844_v50  ;;  %v1943_v50 = vld [vmem:[#allocation10 + $0x6c] ss:$16 sps:$4 sm:$0xff]  }
  0xf7   :  { %913 = vmatprep.subr.bf16.mxu1 %v1849_v51  ;;  %v1941_v51 = vld [vmem:[#allocation10 + $0x68] ss:$16 sps:$4 sm:$0xff]  }
  0xfa   :  { %914 = vmatpush1.bf16.msra.mxu1 %v1847_v52  ;;  %v1946_v52 = vld [vmem:[#allocation10 + $0x8c] ss:$16 sps:$4 sm:$0xff]  }
  0xfb   :  { %915 = vmatprep.subr.bf16.mxu1 %v1852_v53  ;;  %v1944_v53 = vld [vmem:[#allocation10 + $0x88] ss:$16 sps:$4 sm:$0xff]  }
  0xfe   :  { %916 = vmatpush1.bf16.msra.mxu1 %v1850_v54  ;;  %v1949_v54 = vld [vmem:[#allocation10 + $0xac] ss:$16 sps:$4 sm:$0xff]  }
  0xff   :  { %917 = vmatprep.subr.bf16.mxu1 %v1855_v55  ;;  %v1947_v55 = vld [vmem:[#allocation10 + $0xa8] ss:$16 sps:$4 sm:$0xff]  }
 0x102   :  { %918 = vmatpush1.bf16.msra.mxu1 %v1853_v58  ;;  %v1955_v58 = vld [vmem:[#allocation10 + $0xec] ss:$16 sps:$4 sm:$0xff]  }
 0x103   :  { %919 = vmatprep.subr.bf16.mxu1 %v1858_v59  ;;  %v1953_v59 = vld [vmem:[#allocation10 + $0xe8] ss:$16 sps:$4 sm:$0xff]  }
 0x106   :  { %920 = vmatpush1.bf16.msra.mxu1 %v1856_v60  ;;  %v1958_v60 = vld [vmem:[#allocation10 + $0x10c] ss:$16 sps:$4 sm:$0xff]  }
 0x107   :  { %921 = vmatprep.subr.bf16.mxu1 %v1861_v61  ;;  %v1956_v61 = vld [vmem:[#allocation10 + $0x108] ss:$16 sps:$4 sm:$0xff]  }
 0x10a   :  { %922 = vmatpush1.bf16.msra.mxu1 %v1859_v62  ;;  %v1961_v62 = vld [vmem:[#allocation10 + $0x12c] ss:$16 sps:$4 sm:$0xff]  }
 0x10b   :  { %923 = vmatprep.subr.bf16.mxu1 %v1864_v63  ;;  %v1959_v63 = vld [vmem:[#allocation10 + $0x128] ss:$16 sps:$4 sm:$0xff]  }
 0x10e   :  { %924 = vmatpush1.bf16.msra.mxu1 %v1862_v0  ;;  %v1964_v0 = vld [vmem:[#allocation10 + $0x14c] ss:$16 sps:$4 sm:$0xff]  }
 0x10f   :  { %925 = vmatprep.subr.bf16.mxu1 %v1867_v1  ;;  %v1962_v1 = vld [vmem:[#allocation10 + $0x148] ss:$16 sps:$4 sm:$0xff]  }
 0x112   :  { %926 = vmatpush1.bf16.msra.mxu1 %v1865_v2  ;;  %v1967_v2 = vld [vmem:[#allocation10 + $0x16c] ss:$16 sps:$4 sm:$0xff]  }
 0x113   :  { %927 = vmatprep.subr.bf16.mxu1 %v1873_v3  ;;  %v1965_v3 = vld [vmem:[#allocation10 + $0x168] ss:$16 sps:$4 sm:$0xff]  }
 0x116   :  { %928 = vmatpush1.bf16.msra.mxu1 %v1871_v4  ;;  %v1970_v4 = vld [vmem:[#allocation10 + $0x18c] ss:$16 sps:$4 sm:$0xff]  }
 0x117   :  { %929 = vmatprep.subr.bf16.mxu1 %v1879_v5  ;;  %v1968_v5 = vld [vmem:[#allocation10 + $0x188] ss:$16 sps:$4 sm:$0xff]  }
 0x11a   :  { %930 = vmatpush1.bf16.msra.mxu1 %v1877_v6  ;;  %v1973_v6 = vld [vmem:[#allocation10 + $0x1ac] ss:$16 sps:$4 sm:$0xff]  }
 0x11d   :  { %932 = vmatmul.mubr.bf16.vlgmr.msra.gmra.mrb[0].mxu1 %v1881_v7  ;;  %v1971_v7 = vld [vmem:[#allocation10 + $0x1a8] ss:$16 sps:$4 sm:$0xff]  }
 0x145   :  { %v180_v13 = vpop.f32.mrb[0].mxu0 }
 0x146   :  { %v182_v14 = vpop.f32.mrb[1].mxu0  ;;  %v181_v27 = vadd.f32 %v180_v13, %v110_v23 }
 0x147   :  { %v184_v15 = vpop.f32.mrb[2].mxu0  ;;  %v183_v28 = vadd.f32 %v182_v14, %v114_v24 }
 0x148   :  { %v186_v16 = vpop.f32.mrb[3].mxu0  ;;  %v185_v34 = vadd.f32 %v184_v15, %v110_v23 }
 0x149   :  { %v187_v38 = vadd.f32 %v186_v16, %v114_v24  ;;  %v1024_v16 = vsub.s32 2, %v2268_v18  ;;  %v1021_v24 = vrot.slane %v1012_v17, %v2277_v21 }
 0x14b   :  { %v1025_v23 = vrot.slane %v1012_v17, %v1024_v16 }
 0x1f0   :  { %v933_v29 = vpop.f32.mrb[0].mxu1 }
 0x1f1   :  { %v1695_v30 = vadd.f32 %v933_v29, %v296_v25  ;;  %v935_v31 = vpop.f32.mrb[1].mxu1 }
 0x1f2   :  { %v1696_v32 = vadd.f32 %v935_v31, %v300_v26  ;;  %v937_v33 = vpop.f32.mrb[2].mxu1 }
 0x1f3   :  { %v942_v35 = vmul.f32 %v1695_v30, %v181_v27  ;;  %v1697_v36 = vadd.f32 %v937_v33, %v296_v25  ;;  %v939_v37 = vpop.f32.mrb[3].mxu1  ;;  %v1029_v25 = vrot.slane %v1012_v17, %v1028_v20 }
 0x1f4   :  { %v943_v39 = vmul.f32 %v1696_v32, %v183_v28  ;;  %v1698_v40 = vadd.f32 %v939_v37, %v300_v26 }
 0x1f5   :  { %v944_v41 = vmul.f32 %v1697_v36, %v185_v34 }
 0x1f6   :  { %v945_v42 = vmul.f32 %v1698_v40, %v187_v38 }
 0x1f7   :  { %v2286_v43 = vpack.c.bf16 %v944_v41, %v942_v35 }
 0x1f8   :  { %v947_v44 = vpack.c.bf16 %v945_v42, %v943_v39 }
 0x1fa   :  { %1386 = vmatprep.mubr.bf16.mxu0 %v947_v44 }
 0x1fb   :  { %1387 = vmatmul.mubr.bf16.vlgmr.msra.gmra.mrb[4].mxu0 %v2286_v43 }
 0x1fc   :  { %1398 = vmatpush1.bf16.msra.mxu0 %v1932_v45  ;;  %1429 = vmatprep.mubr.bf16.mxu0 %v947_v44 }
 0x1fd   :  { %1399 = vmatprep.subr.bf16.mxu0 %v1937_v46 }
 0x200   :  { %1400 = vmatpush1.bf16.msra.mxu0 %v1935_v47 }
 0x201   :  { %1401 = vmatprep.subr.bf16.mxu0 %v1940_v48 }
 0x204   :  { %1402 = vmatpush1.bf16.msra.mxu0 %v1938_v49 }
 0x205   :  { %1403 = vmatprep.subr.bf16.mxu0 %v1943_v50 }
 0x208   :  { %1404 = vmatpush1.bf16.msra.mxu0 %v1941_v51 }
 0x209   :  { %1405 = vmatprep.subr.bf16.mxu0 %v1946_v52 }
 0x20c   :  { %1406 = vmatpush1.bf16.msra.mxu0 %v1944_v53 }
 0x20d   :  { %1407 = vmatprep.subr.bf16.mxu0 %v1949_v54 }
 0x210   :  { %1408 = vmatpush1.bf16.msra.mxu0 %v1947_v55 }
 0x211   :  { %1409 = vmatprep.subr.bf16.mxu0 %v1952_v56 }
 0x214   :  { %1410 = vmatpush1.bf16.msra.mxu0 %v1950_v57 }
 0x215   :  { %1411 = vmatprep.subr.bf16.mxu0 %v1955_v58 }
 0x218   :  { %1412 = vmatpush1.bf16.msra.mxu0 %v1953_v59 }
 0x219   :  { %1413 = vmatprep.subr.bf16.mxu0 %v1958_v60 }
 0x21c   :  { %1414 = vmatpush1.bf16.msra.mxu0 %v1956_v61 }
 0x21d   :  { %1415 = vmatprep.subr.bf16.mxu0 %v1961_v62 }
 0x220   :  { %1416 = vmatpush1.bf16.msra.mxu0 %v1959_v63 }
 0x221   :  { %1417 = vmatprep.subr.bf16.mxu0 %v1964_v0 }
 0x224   :  { %1418 = vmatpush1.bf16.msra.mxu0 %v1962_v1 }
 0x225   :  { %1419 = vmatprep.subr.bf16.mxu0 %v1967_v2 }
 0x228   :  { %1420 = vmatpush1.bf16.msra.mxu0 %v1965_v3 }
 0x229   :  { %1421 = vmatprep.subr.bf16.mxu0 %v1970_v4 }
 0x22c   :  { %1422 = vmatpush1.bf16.msra.mxu0 %v1968_v5 }
 0x22d   :  { %1423 = vmatprep.subr.bf16.mxu0 %v1973_v6 }
 0x230   :  { %1424 = vmatpush1.bf16.msra.mxu0 %v1971_v7 }
 0x231   :  { %1425 = vmatprep.subr.bf16.mxu0 %v1976_v8 }
 0x234   :  { %1426 = vmatpush1.bf16.msra.mxu0 %v1974_v9 }
 0x235   :  { %1427 = vmatprep.subr.bf16.mxu0 %v1979_v10 }
 0x238   :  { %1428 = vmatpush1.bf16.msra.mxu0 %v1977_v11 }
 0x23b   :  { %1430 = vmatmul.mubr.bf16.vlgmr.msra.gmra.mrb[8].mxu0 %v2286_v43 }
 0x2ce   :  { %v1388_v12 = vpop.f32.mrb[4].mxu0 }
 0x2cf   :  { %v1390_v13 = vpop.f32.mrb[5].mxu0  ;;  %v1389_v27 = vadd.f32 %v1388_v12, %v1017_v22 }
 0x2d0   :  { %v1392_v14 = vpop.f32.mrb[6].mxu0  ;;  %v1391_v30 = vadd.f32 %v1390_v13, %v1021_v24 }
 0x2d1   :  { %v1394_v15 = vpop.f32.mrb[7].mxu0  ;;  %v1393_v36 = vadd.f32 %v1392_v14, %v1017_v22 }
 0x2d2   :  { %v1395_v37 = vadd.f32 %v1394_v15, %v1021_v24 }
 0x30e   :  { %v1431_v26 = vpop.f32.mrb[8].mxu0 }
 0x30f   :  { %v1432_v28 = vadd.f32 %v1431_v26, %v1025_v23  ;;  %v1433_v29 = vpop.f32.mrb[9].mxu0 }
 0x310   :  { %v1434_v31 = vadd.f32 %v1433_v29, %v1029_v25  ;;  %v1435_v32 = vpop.f32.mrb[10].mxu0 }
 0x311   :  { %v1436_v33 = vadd.f32 %v1435_v32, %v1025_v23  ;;  %v1437_v34 = vpop.f32.mrb[11].mxu0  ;;  %v1440_v35 = vmax.f32 %v1389_v27, %v1432_v28 }
 0x312   :  { %v1438_v38 = vadd.f32 %v1437_v34, %v1029_v25  ;;  %v1441_v18 = vmax.f32 %v1391_v30, %v1434_v31 }
 0x313   :  { %v1445_v39 = vmax.f32 %v1393_v36, %v1436_v33 }
 0x314   :  { %v1446_v19 = vmax.f32 %v1395_v37, %v1438_v38  ;;  %v1442_v40 = vmax.f32 %v1440_v35, %v1441_v18 }
 0x316   :  { %1443 = vmax.xlane.f32.xlu0 %v1442_v40  ;;  %v1447_v21 = vmax.f32 %v1445_v39, %v1446_v19 }
 0x31a   :  { %1448 = vmax.xlane.f32.xlu0 %v1447_v21 }
 0x3a3   :  { %v1444_v41 = vpop.xlane.xlu0 %1443 }
 0x3a4   :  { %v1450_v42 = vsub.f32 %v1389_v27, %v1444_v41  ;;  %v1451_v43 = vsub.f32 %v1391_v30, %v1444_v41  ;;  %v1452_v44 = vsub.f32 %v1432_v28, %v1444_v41  ;;  %v1453_v45 = vsub.f32 %v1434_v31, %v1444_v41 }
 0x3a6   :  { %v1458_v46 = vmul.f32 1.442695, %v1450_v42  ;;  %v1460_v47 = vmul.f32 1.442695, %v1451_v43  ;;  %v1462_v48 = vmul.f32 1.442695, %v1452_v44 }
 0x3a7   :  { %v1464_v49 = vmul.f32 1.442695, %v1453_v45  ;;  %v1449_v50 = vpop.xlane.xlu0 %1448 }
 0x3a8   :  { %1980 = vpow2.f32 %v1458_v46  ;;  %v1454_v51 = vsub.f32 %v1393_v36, %v1449_v50  ;;  %v1455_v52 = vsub.f32 %v1395_v37, %v1449_v50  ;;  %v1456_v53 = vsub.f32 %v1436_v33, %v1449_v50 }
 0x3a9   :  { %1982 = vpow2.f32 %v1460_v47  ;;  %v1457_v54 = vsub.f32 %v1438_v38, %v1449_v50 }
 0x3aa   :  { %1984 = vpow2.f32 %v1462_v48  ;;  %v1466_v55 = vmul.f32 1.442695, %v1454_v51  ;;  %v1468_v56 = vmul.f32 1.442695, %v1455_v52  ;;  %v1470_v57 = vmul.f32 1.442695, %v1456_v53 }
 0x3ab   :  { %1986 = vpow2.f32 %v1464_v49  ;;  %v1472_v58 = vmul.f32 1.442695, %v1457_v54 }
 0x3ac   :  { %1988 = vpow2.f32 %v1466_v55 }
 0x3ad   :  { %1990 = vpow2.f32 %v1468_v56 }
 0x3ae   :  { %1992 = vpow2.f32 %v1470_v57 }
 0x3af   :  { %1994 = vpow2.f32 %v1472_v58 }
 0x3b2   :  { %v1981_v59 = vpop.eup %1980 }
 0x3b3   :  { %v1983_v60 = vpop.eup %1982 }
 0x3b4   :  { %v1985_v61 = vpop.eup %1984  ;;  %v1474_v62 = vadd.f32 %v1983_v60, %v1981_v59 }
 0x3b5   :  { %v1987_v63 = vpop.eup %1986 }
 0x3b6   :  { %v1989_v0 = vpop.eup %1988  ;;  %v1475_v1 = vadd.f32 %v1985_v61, %v1474_v62 }
 0x3b7   :  { %v1991_v2 = vpop.eup %1990 }
 0x3b8   :  { %v1476_v3 = vadd.f32 %v1987_v63, %v1475_v1  ;;  %v1479_v4 = vadd.f32 %v1991_v2, %v1989_v0  ;;  %v1993_v5 = vpop.eup %1992 }
 0x3b9   :  { %v1995_v7 = vpop.eup %1994 }
 0x3ba   :  { %1477 = vadd.xlane.f32.xlu1 %v1476_v3  ;;  %v1480_v6 = vadd.f32 %v1993_v5, %v1479_v4 }
 0x3bc   :  { %v1481_v8 = vadd.f32 %v1995_v7, %v1480_v6 }
 0x3be   :  { %1482 = vadd.xlane.f32.xlu1 %v1481_v8 }
 0x447   :  { %v1478_v9 = vpop.xlane.xlu1 %1477 }
 0x448   :  { %1996 = vlog2.f32 %v1478_v9 }
 0x44b   :  { %v1483_v10 = vpop.xlane.xlu1 %1482 }
 0x44c   :  { %1998 = vlog2.f32 %v1483_v10 }
 0x452   :  { %v1997_v11 = vpop.eup %1996 }
 0x453   :  { %v1485_v12 = vmul.f32 0.6931472, %v1997_v11 }
 0x455   :  { %v1488_v13 = vsub.f32 %v1450_v42, %v1485_v12  ;;  %v1489_v14 = vsub.f32 %v1451_v43, %v1485_v12  ;;  %v1490_v15 = vsub.f32 %v1452_v44, %v1485_v12  ;;  %v1491_v16 = vsub.f32 %v1453_v45, %v1485_v12 }
 0x456   :  { %v1999_v17 = vpop.eup %1998 }
 0x457   :  { %1496 = vst [vmem:[#allocation11] sm:$0xff] %v1488_v13  ;;  %1497 = vst [vmem:[#allocation11 + $0x8] sm:$0xff] %v1489_v14  ;;  %v1487_v20 = vmul.f32 0.6931472, %v1999_v17 }
 0x458   :  { %1498 = vst [vmem:[#allocation11 + $0x10] sm:$0xff] %v1490_v15  ;;  %1499 = vst [vmem:[#allocation11 + $0x18] sm:$0xff] %v1491_v16 }
 0x459   :  { %v1492_v22 = vsub.f32 %v1454_v51, %v1487_v20  ;;  %v1493_v23 = vsub.f32 %v1455_v52, %v1487_v20  ;;  %v1494_v24 = vsub.f32 %v1456_v53, %v1487_v20  ;;  %v1495_v25 = vsub.f32 %v1457_v54, %v1487_v20 }
 0x45b   :  { %1500 = vst [vmem:[#allocation11 + $0x20] sm:$0xff] %v1492_v22  ;;  %1501 = vst [vmem:[#allocation11 + $0x28] sm:$0xff] %v1493_v23 }
 0x45c   :  { %1502 = vst [vmem:[#allocation11 + $0x30] sm:$0xff] %v1494_v24  ;;  %1503 = vst [vmem:[#allocation11 + $0x38] sm:$0xff] %v1495_v25 }
 0x45d   :  { %2121 = shalt.err (!%p2118_p2)
}
 0x45e   :  { %s2122_s10 = scalar_lea.hbm %s2317_s8, 1024 }
 0x45f   :  { %p2123_p3 = scmp.ne.s32.totalorder %s2317_s8, %s2122_s10  ;;  %p2126_p4 = scmp.lt.u32.totalorder %s2122_s10, %s2317_s8 }
 0x461   :  { %p2128_p5 = pnand %p2126_p4, %p2123_p3 }
 0x463   :  { %2131 = shalt.err (!%p2128_p5)
}
 0x464   :  { %s2155_s22 = smov 512   ;;  %s2156_s14 = smov 32  }
 0x465   :  { %1515 = dma.vmem_to_hbm [thread:$0]  %s1510_s27, 1024, %s2317_s8, [#allocation4], %s2155_s22, %s2155_s22, %s2156_s14  }
 0x466   :  { %2138 = dma.done.wait [#allocation4], 1024  }
 0x467   :  { %2139 = vsyncadd [#allocation4], 4294966272 }
 0x468   :  { %1519 = vsyncpa [#allocation3], 1 }
 0x469   :  { %1520 = vsyncpa [#allocation6], 1 }
 0x46a   :  { %1521 = vsyncpa [#allocation9], 1 }
 0x46b   :  { %1522 = vsyncpa [#allocation4], 1 }

</bundles_post_ra>
